<compile_context>
chip_gen: v7x
topology: tpu7x:2x2x1
jax: 0.10.0
libtpu: 0.0.40
codegen_flags: <defaults>
</compile_context>

<pallas_src>
import functools

import jax
import jax.numpy as jnp
from jax.experimental import pallas as pl
from jax.experimental.pallas import tpu as pltpu


# ----------------------------------------------------------------------------
# Kernels (single-pass moments, f32 accumulation)
# ----------------------------------------------------------------------------
def _ln_bias_kernel(x_ref, w_ref, b_ref, o_ref, *, eps: float):
    x = x_ref[...].astype(jnp.float32)                         # (tile_rows, d)
    inv_d = 1.0 / x.shape[-1]
    s1 = jnp.sum(x, axis=-1, keepdims=True)
    s2 = jnp.sum(x * x, axis=-1, keepdims=True)
    mean = s1 * inv_d
    var = jnp.maximum(s2 * inv_d - mean * mean, 0.0)            # unbiased=False
    inv = jax.lax.rsqrt(var + eps)
    y = (x - mean) * inv * w_ref[...] + b_ref[...]              # w/b already f32
    o_ref[...] = y.astype(o_ref.dtype)


def _ln_nobias_kernel(x_ref, w_ref, o_ref, *, eps: float):
    x = x_ref[...].astype(jnp.float32)
    inv_d = 1.0 / x.shape[-1]
    s1 = jnp.sum(x, axis=-1, keepdims=True)
    s2 = jnp.sum(x * x, axis=-1, keepdims=True)
    mean = s1 * inv_d
    var = jnp.maximum(s2 * inv_d - mean * mean, 0.0)
    inv = jax.lax.rsqrt(var + eps)
    o_ref[...] = ((x - mean) * inv * w_ref[...]).astype(o_ref.dtype)


# ----------------------------------------------------------------------------
# Tiling heuristics
# ----------------------------------------------------------------------------
def _round_up(x: int, m: int) -> int:
    return (x + m - 1) // m * m


def _sublane_multiple(dtype) -> int:
    """Minimum sublane tile for the I/O dtype (packing-aware)."""
    bits = jnp.dtype(dtype).itemsize * 8
    if bits >= 32:
        return 8
    if bits == 16:
        return 16
    return 32                                  # int8 / fp8


def _device_kind() -> str:
    try:
        return jax.devices()[0].device_kind.lower()
    except Exception:
        return ""


def _vmem_capacity_bytes() -> int:
    try:
        return int(pltpu.get_tpu_info().vmem_capacity_bytes)
    except Exception:
        pass
    # Generation-aware fallback: v7x has 64 MiB per TC, v5e/v6e have 128 MiB.
    kind = _device_kind()
    if "v7" in kind:
        return 64 * 1024 * 1024
    if kind:
        return 128 * 1024 * 1024
    return 64 * 1024 * 1024                    # conservative last resort


def _num_tensorcores() -> int:
    # v7x has 2 TensorCores per chip; v5e/v6e have 1.
    return 2 if "v7" in _device_kind() else 1


def _pick_tile_rows(rows: int, d_model: int, dtype_bytes: int,
                    vmem_bytes: int, sublane: int, num_cores: int) -> int:
    # Per-row VMEM footprint: double-buffered input + output tiles in the I/O
    # dtype plus ~2 live f32-wide intermediates (single-pass moments removed
    # the centered temporary).
    per_row = d_model * (2 * 2 * dtype_bytes + 2 * 4)
    budget = int(vmem_bytes * 0.6)
    max_rows_vmem = max(sublane, budget // per_row)

    # Byte-based cap: ~4 MiB of input per tile keeps the ~0.35 us per-grid-step
    # overhead <10% of step time on all generations, even for narrow d_model.
    target_tile_bytes = 4 * 1024 * 1024
    max_rows_bytes = max(sublane, target_tile_bytes // (d_model * dtype_bytes))

    max_rows = min(max_rows_vmem, max_rows_bytes)
    tile = sublane
    while tile * 2 <= max_rows:
        tile *= 2

    # Don't use a tile taller than the (sublane-aligned) problem; any remainder
    # is a masked ragged last block handled by Pallas.
    if rows >= sublane:
        tile = min(tile, (rows // sublane) * sublane)
    tile = max(sublane, tile)

    # v7x: make sure the 1-D "parallel" grid has >= 2 steps so both
    # TensorCores get work; prefer an even-ish split for tiny grids.
    if num_cores > 1:
        while tile > sublane and pl.cdiv(rows, tile) < num_cores:
            tile = max(sublane, _round_up(tile // 2, sublane))
        g = pl.cdiv(rows, tile)
        if tile > sublane and g < 4 and g % num_cores != 0:
            tile = max(sublane, _round_up(tile // 2, sublane))
    return tile


def _vmem_limit_bytes(tile_rows: int, d_model: int, dtype_bytes: int,
                      vmem_bytes: int) -> int:
    io = 2 * 2 * tile_rows * d_model * dtype_bytes   # double-buffered in + out
    temps = 2 * tile_rows * d_model * 4              # live f32 intermediates
    params = 2 * 2 * d_model * 4                     # weight + bias buffers
    want = io + temps + params + (2 << 20)           # scheduler headroom
    cap = int(vmem_bytes * 0.78)                     # keep clear of physical
    return int(min(cap, max(32 * 1024 * 1024, want)))


# ----------------------------------------------------------------------------
# Wrapper
# ----------------------------------------------------------------------------
def layer_norm(x: jax.Array, weight: jax.Array, bias=None,
               eps: float = 1e-5, tile_rows: int | None = None) -> jax.Array:
    """LayerNorm over the last axis of x, for arbitrary leading dims."""
    orig_shape = x.shape
    d_model = orig_shape[-1]
    x2 = x.reshape(-1, d_model)
    rows = x2.shape[0]
    dtype_bytes = jnp.dtype(x.dtype).itemsize
    sublane = _sublane_multiple(x.dtype)

    vmem_bytes = _vmem_capacity_bytes()
    num_cores = _num_tensorcores()
    if tile_rows is None:
        tile_rows = _pick_tile_rows(rows, d_model, dtype_bytes, vmem_bytes,
                                    sublane, num_cores)
    tile_rows = max(sublane, _round_up(tile_rows, sublane))

    # TODO(synk): for d_model not a multiple of 128 the store path uses masked
    # vst.msk; a lane-dense repack in the wrapper would speed up the store path
    # on v5e (single vst slot), but it is a no-op for typical transformer widths.

    w2 = weight.astype(jnp.float32).reshape(1, d_model)
    x_spec = pl.BlockSpec((tile_rows, d_model), lambda i: (i, 0))
    param_spec = pl.BlockSpec((1, d_model), lambda i: (0, 0))

    if bias is not None:
        kernel = functools.partial(_ln_bias_kernel, eps=eps)
        operands = (x2, w2, bias.astype(jnp.float32).reshape(1, d_model))
        in_specs = [x_spec, param_spec, param_spec]
    else:
        kernel = functools.partial(_ln_nobias_kernel, eps=eps)
        operands = (x2, w2)
        in_specs = [x_spec, param_spec]

    out = pl.pallas_call(
        kernel,
        out_shape=jax.ShapeDtypeStruct((rows, d_model), x.dtype),
        grid_spec=pltpu.PrefetchScalarGridSpec(
            num_scalar_prefetch=0,
            grid=(pl.cdiv(rows, tile_rows),),
            in_specs=in_specs,
            out_specs=pl.BlockSpec((tile_rows, d_model), lambda i: (i, 0)),
        ),
        compiler_params=pltpu.CompilerParams(
            dimension_semantics=("parallel",),
            vmem_limit_bytes=_vmem_limit_bytes(
                tile_rows, d_model, dtype_bytes, vmem_bytes),
        ),
    )(*operands)

    return out.reshape(orig_shape)


def layer_norm_reference(x, weight, bias, eps=1e-5):
    xf = x.astype(jnp.float32)
    mean = jnp.mean(xf, axis=-1, keepdims=True)
    var = jnp.mean((xf - mean) ** 2, axis=-1, keepdims=True)
    y = (xf - mean) / jnp.sqrt(var + eps)
    if bias is not None:
        y = y * weight.astype(jnp.float32) + bias.astype(jnp.float32)
    else:
        y = y * weight.astype(jnp.float32)
    return y.astype(x.dtype)


if __name__ == "__main__":
    key = jax.random.PRNGKey(0)
    batch, seq, d_model = 2, 8, 32

    x = jax.random.normal(key, (batch, seq, d_model), dtype=jnp.float32)

    # Deterministic params matching nn.Parameter(torch.ones / torch.zeros)
    weight = jnp.ones((d_model,), dtype=jnp.float32)
    bias = jnp.zeros((d_model,), dtype=jnp.float32)
    eps = 1e-5

    # bias=True path
    y = jax.block_until_ready(layer_norm(x, weight, bias, eps=eps))
    y_ref = layer_norm_reference(x, weight, bias, eps=eps)
    assert y.shape == x.shape
    assert jnp.allclose(y, y_ref, atol=1e-5, rtol=1e-5), "mismatch (bias=True)"

    # bias=False path (module supports bias=False)
    y_nb = jax.block_until_ready(layer_norm(x, weight, None, eps=eps))
    y_nb_ref = layer_norm_reference(x, weight, None, eps=eps)
    assert jnp.allclose(y_nb, y_nb_ref, atol=1e-5, rtol=1e-5), "mismatch (bias=False)"

    # Ragged-row path (rows not a multiple of tile_rows) — no pad round-trip.
    x3 = jax.random.normal(jax.random.PRNGKey(1), (3, 5, d_model), jnp.float32)
    y3 = jax.block_until_ready(layer_norm(x3, weight, bias, eps=eps))
    y3_ref = layer_norm_reference(x3, weight, bias, eps=eps)
    assert jnp.allclose(y3, y3_ref, atol=1e-5, rtol=1e-5), "mismatch (ragged)"

    # bf16 path (exercises the 16-row sublane rounding); f32 accumulation
    # inside the kernel, so only the final cast differs from the reference.
    xb = jax.random.normal(jax.random.PRNGKey(2),
                           (batch, seq, d_model)).astype(jnp.bfloat16)
    yb = jax.block_until_ready(layer_norm(xb, weight, bias, eps=eps))
    yb_ref = layer_norm_reference(xb, weight, bias, eps=eps)
    assert jnp.allclose(yb.astype(jnp.float32), yb_ref.astype(jnp.float32),
                        atol=2e-2, rtol=2e-2), "mismatch (bf16)"

    print("KERNEL_OK")
</pallas_src>

<mosaic_0001>
module attributes {stable_mosaic.version = 11 : i64} {
  func.func @_ln_bias_kernel(%arg0: i32, %arg1: memref<16x32xf32, #tpu.memory_space<vmem>>, %arg2: memref<1x32xf32, #tpu.memory_space<vmem>>, %arg3: memref<1x32xf32, #tpu.memory_space<vmem>>, %arg4: memref<16x32xf32, #tpu.memory_space<vmem>>) attributes {dimension_semantics = [#tpu.dimension_semantics<parallel>], iteration_bounds = array<i64: 1>, scalar_prefetch = 0 : i64, scratch_operands = 0 : i64, tpu.core_type = #tpu.core_type<tc>, window_params = [{transform_indices = @transform_0, window_bounds = array<i64: 16, 32>}, {pipeline_mode = #tpu.pipeline_mode<synchronous>, transform_indices = @transform_1, window_bounds = array<i64: 1, 32>}, {pipeline_mode = #tpu.pipeline_mode<synchronous>, transform_indices = @transform_2, window_bounds = array<i64: 1, 32>}, {transform_indices = @transform_3, window_bounds = array<i64: 16, 32>}]} {
    %c0 = arith.constant 0 : index
    %c0_0 = arith.constant 0 : index
    %0 = vector.load %arg1[%c0, %c0_0] : memref<16x32xf32, #tpu.memory_space<vmem>>, vector<16x32xf32>
    %cst = arith.constant dense<0.000000e+00> : vector<16xf32>
    %1 = vector.multi_reduction <add>, %0, %cst [1] : vector<16x32xf32> to vector<16xf32>
    %2 = vector.shape_cast %1 : vector<16xf32> to vector<16x1xf32>
    %3 = arith.mulf %0, %0 : vector<16x32xf32>
    %cst_1 = arith.constant dense<0.000000e+00> : vector<16xf32>
    %4 = vector.multi_reduction <add>, %3, %cst_1 [1] : vector<16x32xf32> to vector<16xf32>
    %5 = vector.shape_cast %4 : vector<16xf32> to vector<16x1xf32>
    %cst_2 = arith.constant 3.125000e-02 : f32
    %6 = vector.broadcast %cst_2 : f32 to vector<16x1xf32>
    %7 = arith.mulf %2, %6 : vector<16x1xf32>
    %cst_3 = arith.constant 3.125000e-02 : f32
    %8 = vector.broadcast %cst_3 : f32 to vector<16x1xf32>
    %9 = arith.mulf %5, %8 : vector<16x1xf32>
    %10 = arith.mulf %7, %7 : vector<16x1xf32>
    %11 = arith.subf %9, %10 : vector<16x1xf32>
    %cst_4 = arith.constant 0.000000e+00 : f32
    %12 = vector.broadcast %cst_4 : f32 to vector<16x1xf32>
    %13 = arith.maximumf %11, %12 : vector<16x1xf32>
    %cst_5 = arith.constant 9.99999974E-6 : f32
    %14 = vector.broadcast %cst_5 : f32 to vector<16x1xf32>
    %15 = arith.addf %13, %14 : vector<16x1xf32>
    %16 = math.rsqrt %15 : vector<16x1xf32>
    %17 = vector.broadcast %7 : vector<16x1xf32> to vector<16x32xf32>
    %18 = arith.subf %0, %17 : vector<16x32xf32>
    %19 = vector.broadcast %16 : vector<16x1xf32> to vector<16x32xf32>
    %20 = arith.mulf %18, %19 : vector<16x32xf32>
    %c0_6 = arith.constant 0 : index
    %c0_7 = arith.constant 0 : index
    %21 = vector.load %arg2[%c0_6, %c0_7] : memref<1x32xf32, #tpu.memory_space<vmem>>, vector<1x32xf32>
    %22 = vector.broadcast %21 : vector<1x32xf32> to vector<16x32xf32>
    %23 = arith.mulf %20, %22 : vector<16x32xf32>
    %c0_8 = arith.constant 0 : index
    %c0_9 = arith.constant 0 : index
    %24 = vector.load %arg3[%c0_8, %c0_9] : memref<1x32xf32, #tpu.memory_space<vmem>>, vector<1x32xf32>
    %25 = vector.broadcast %24 : vector<1x32xf32> to vector<16x32xf32>
    %26 = arith.addf %23, %25 : vector<16x32xf32>
    %c0_10 = arith.constant 0 : index
    %c0_11 = arith.constant 0 : index
    %27 = vector.load %arg4[%c0_10, %c0_11] : memref<16x32xf32, #tpu.memory_space<vmem>>, vector<16x32xf32>
    tpu.vector_store %arg4[%c0_10, %c0_11], %26 {strides = array<i32>} : memref<16x32xf32, #tpu.memory_space<vmem>>, vector<16x32xf32>,
    return
  }
  func.func @transform_0(%arg0: i32) -> (i32, i32) {
    %c0_i32 = arith.constant 0 : i32
    %c0_i32_0 = arith.constant 0 : i32
    return %arg0, %c0_i32 : i32, i32
  }
  func.func @transform_1(%arg0: i32) -> (i32, i32) {
    %c0_i32 = arith.constant 0 : i32
    %c0_i32_0 = arith.constant 0 : i32
    %c0_i32_1 = arith.constant 0 : i32
    return %c0_i32, %c0_i32_0 : i32, i32
  }
  func.func @transform_2(%arg0: i32) -> (i32, i32) {
    %c0_i32 = arith.constant 0 : i32
    %c0_i32_0 = arith.constant 0 : i32
    %c0_i32_1 = arith.constant 0 : i32
    return %c0_i32, %c0_i32_0 : i32, i32
  }
  func.func @transform_3(%arg0: i32) -> (i32, i32) {
    %c0_i32 = arith.constant 0 : i32
    %c0_i32_0 = arith.constant 0 : i32
    return %arg0, %c0_i32 : i32, i32
  }
}

</mosaic_0001>

<bundles_post_ra>
// kernel: tpu_custom_call.1
= control target key start
LH: loop header
LB: loop body
LE: loop exit
PB: predicated region body
PF: predicated region fallthrough
CT: control target
= control target key end

     0   :  { %8 = vsyncpa [#allocation3], 0  ;;  %s225_s0 = inlined_call_operand.hbm [shape: f32[16,32], index: 0, kind: input, shape index: {}]   ;;  %s226_s1 = inlined_call_operand.vmem [shape: f32[1,32], index: 1, kind: input, shape index: {}]   ;;  %s227_s2 = inlined_call_operand.vmem [shape: f32[1,32], index: 2, kind: input, shape index: {}]   ;;  %s228_s3 = inlined_call_operand.hbm [shape: f32[16,32], index: 3, kind: output, shape index: {}]  }
   0x1   :  { %9 = vsyncpa [#allocation4], 0  ;;  %s159_s12 = smov [#allocation2]   ;;  %s111_s16 = scalar_lea.hbm %s225_s0, 256 }
   0x2   :  { %s15_s13 = sshll.u32 %s159_s12, 4  ;;  %p112_p0 = scmp.ne.s32.totalorder %s225_s0, %s111_s16  ;;  %s16_s13 = int_to_ptr.vmem [resolvable:$true] %s15_s13 }
   0x3   :  { %p115_p1 = scmp.lt.u32.totalorder %s111_s16, %s225_s0 }
   0x5   :  { %p117_p2 = pnand %p115_p1, %p112_p0 }
   0x7   :  { %120 = shalt.err (!%p117_p2)
}
   0x8   :  { %s121_s21 = scalar_lea.vmem %s16_s13, 256  ;;  %p126_p4 = scmp.lt.s32.totalorder %s16_s13, %s16_s13 }
   0x9   :  { %p122_p3 = scmp.ne.s32.totalorder %s16_s13, %s121_s21  ;;  %p127_p5 = scmp.lt.s32.totalorder %s121_s21, %s121_s21 }
   0xb   :  { %p128_p6 = por %p127_p5, %p126_p4 }
   0xd   :  { %p129_p7 = pnand %p128_p6, %p122_p3 }
   0xf   :  { %132 = shalt.err (!%p129_p7)
}
  0x10   :  { %s160_s22 = smov 128   ;;  %s161_s23 = smov 8  }
  0x11   :  { %21 = dma.hbm_to_vmem [thread:$0]  %s225_s0, 256, %s16_s13, [#allocation3], %s160_s22, %s160_s22, %s161_s23  }
  0x12   :  { %155 = dma.done.wait [#allocation3], 256  }
  0x13   :  { %156 = vsyncadd [#allocation3], 4294967040  ;;  %vm31_vm0 = vcmask 261120   ;;  %v29_v0 = vld [vmem:[#allocation2] sm:$0xff]  ;;  %v30_v1 = vld [vmem:[#allocation2 + $0x8] sm:$0xff]  ;;  %s162_s29 = smov [#allocation5]  }
  0x14   :  { %v32_v2 = vsel %vm31_vm0, %v29_v0, 0.0  ;;  %v38_v3 = vmul.f32 %v29_v0, %v29_v0  ;;  %v39_v4 = vmul.f32 %v30_v1, %v30_v1  ;;  %v35_v6 = vsel %vm31_vm0, %v30_v1, 0.0  ;;  %v101_v26 = vld [vmem:[%s226_s1] ss:$0 sm:$0xff]  ;;  %s89_s30 = sshll.u32 %s162_s29, 4  ;;  %s90_s30 = int_to_ptr.vmem [resolvable:$true] %s89_s30 }
  0x15   :  { %33 = vadd.xlane.f32.xlu0 %v32_v2  ;;  %v102_v28 = vld [vmem:[%s227_s2] ss:$0 sm:$0xff]  ;;  %s133_s1 = scalar_lea.vmem %s90_s30, 256  ;;  %p138_p9 = scmp.lt.s32.totalorder %s90_s30, %s90_s30 }
  0x16   :  { %v40_v5 = vsel %vm31_vm0, %v38_v3, 0.0  ;;  %v43_v7 = vsel %vm31_vm0, %v39_v4, 0.0  ;;  %p134_p8 = scmp.ne.s32.totalorder %s90_s30, %s133_s1  ;;  %p139_p10 = scmp.lt.s32.totalorder %s133_s1, %s133_s1 }
  0x17   :  { %41 = vadd.xlane.f32.xlu1 %v40_v5 }
  0x18   :  { %p140_p11 = por %p139_p10, %p138_p9 }
  0x19   :  { %36 = vadd.xlane.f32.xlu0 %v35_v6 }
  0x1a   :  { %p141_p12 = pnand %p140_p11, %p134_p8 }
  0x1b   :  { %44 = vadd.xlane.f32.xlu1 %v43_v7 }
  0xa2   :  { %v34_v8 = vpop.xlane.xlu0 %33 }
  0xa3   :  { %v46_v9 = vmul.f32 0.03125, %v34_v8 }
  0xa4   :  { %v42_v10 = vpop.xlane.xlu1 %41 }
  0xa5   :  { %v50_v11 = vmul.f32 %v46_v9, %v46_v9  ;;  %v48_v12 = vmul.f32 0.03125, %v42_v10  ;;  %v60_v24 = vsub.f32 %v29_v0, %v46_v9 }
  0xa6   :  { %v37_v13 = vpop.xlane.xlu0 %36 }
  0xa7   :  { %v52_v14 = vsub.f32 %v48_v12, %v50_v11  ;;  %v47_v15 = vmul.f32 0.03125, %v37_v13 }
  0xa8   :  { %v45_v16 = vpop.xlane.xlu1 %44 }
  0xa9   :  { %v54_v17 = vmax.f32 %v52_v14, 0.0  ;;  %v51_v18 = vmul.f32 %v47_v15, %v47_v15  ;;  %v49_v19 = vmul.f32 0.03125, %v45_v16  ;;  %v61_v29 = vsub.f32 %v30_v1, %v47_v15 }
  0xab   :  { %v56_v20 = vadd.f32 1e-05, %v54_v17  ;;  %v53_v21 = vsub.f32 %v49_v19, %v51_v18 }
  0xad   :  { %107 = vrsqrt.f32 %v56_v20  ;;  %v55_v22 = vmax.f32 %v53_v21, 0.0 }
  0xaf   :  { %v57_v23 = vadd.f32 1e-05, %v55_v22 }
  0xb1   :  { %109 = vrsqrt.f32 %v57_v23 }
  0xb7   :  { %v108_v25 = vpop.eup %107 }
  0xb8   :  { %v62_v27 = vmul.f32 %v108_v25, %v60_v24 }
  0xba   :  { %v71_v30 = vmul.f32 %v101_v26, %v62_v27 }
  0xbb   :  { %v110_v31 = vpop.eup %109 }
  0xbc   :  { %v63_v32 = vmul.f32 %v110_v31, %v61_v29  ;;  %v80_v33 = vadd.f32 %v102_v28, %v71_v30 }
  0xbe   :  { %v72_v34 = vmul.f32 %v101_v26, %v63_v32  ;;  %82 = vst.msk [vmem:[#allocation5] sm:$0xff] %vm31_vm0, %v80_v33 }
  0xc0   :  { %v81_v35 = vadd.f32 %v102_v28, %v72_v34 }
  0xc2   :  { %83 = vst.msk [vmem:[#allocation5 + $0x8] sm:$0xff] %vm31_vm0, %v81_v35 }
  0xc3   :  { %144 = shalt.err (!%p141_p12)
}
  0xc4   :  { %s145_s5 = scalar_lea.hbm %s228_s3, 256 }
  0xc5   :  { %p146_p13 = scmp.ne.s32.totalorder %s228_s3, %s145_s5  ;;  %p149_p0 = scmp.lt.u32.totalorder %s145_s5, %s228_s3 }
  0xc7   :  { %p151_p1 = pnand %p149_p0, %p146_p13 }
  0xc9   :  { %154 = shalt.err (!%p151_p1)
}
  0xca   :  { %95 = dma.vmem_to_hbm [thread:$0]  %s90_s30, 256, %s228_s3, [#allocation4], %s160_s22, %s160_s22, %s161_s23  }
  0xcb   :  { %157 = dma.done.wait [#allocation4], 256  }
  0xcc   :  { %158 = vsyncadd [#allocation4], 4294967040 }
  0xcd   :  { %99 = vsyncpa [#allocation3], 1 }
  0xce   :  { %100 = vsyncpa [#allocation4], 1 }

</bundles_post_ra>
